<compile_context>
chip_gen: v6e
topology: v6e:2x2x1
jax: 0.10.0
libtpu: 0.0.40
codegen_flags: <defaults>
</compile_context>

<pallas_src>
import functools

import numpy as np
import jax
import jax.numpy as jnp
from jax import lax
from jax.experimental import pallas as pl
from jax.experimental.pallas import tpu as pltpu


def fcnet_kernel(x_ref, w1_ref, w2_ref, fw1_ref, fb1_ref, fw2_ref, fb2_ref,
                 out_ref, xpad_ref, h1p_ref, *, B, H, W):
    f32, bf16 = jnp.float32, jnp.bfloat16
    L0 = x_ref.shape[2]          # W * Cin  (input row lanes)
    L1 = w1_ref.shape[1]         # W * C1   (conv1 output row lanes)
    WC2 = w2_ref.shape[1]        # W * C2   (conv2 output row lanes)
    C2 = WC2 // W
    Ho = H // 2

    # ---- H-padded input scratch (W 'same' padding is baked into the bands) --
    xpad_ref[:, pl.ds(0, 1), :] = jnp.zeros((B, 1, L0), f32)
    xpad_ref[:, pl.ds(H + 1, 1), :] = jnp.zeros((B, 1, L0), f32)
    xpad_ref[:, pl.ds(1, H), :] = x_ref[...]

    # ---- conv1 + relu: one matmul, the 3 H-taps stacked along K --------------
    p1 = jnp.concatenate([xpad_ref[:, pl.ds(dh, H), :] for dh in range(3)],
                         axis=-1).reshape(B * H, 3 * L0)
    h1 = jnp.maximum(
        jnp.dot(p1.astype(bf16), w1_ref[...], preferred_element_type=f32), 0.0)

    # ---- H-halo scratch feeding conv2 ----------------------------------------
    h1p_ref[:, pl.ds(0, 1), :] = jnp.zeros((B, 1, L1), f32)
    h1p_ref[:, pl.ds(H + 1, 1), :] = jnp.zeros((B, 1, L1), f32)
    h1p_ref[:, pl.ds(1, H), :] = h1.reshape(B, H, L1)

    # ---- conv2 + relu: one matmul, 3 H-taps stacked along K ------------------
    p2 = jnp.concatenate([h1p_ref[:, pl.ds(dh, H), :] for dh in range(3)],
                         axis=-1).reshape(B * H, 3 * L1)
    h2 = jnp.maximum(
        jnp.dot(p2.astype(bf16), w2_ref[...], preferred_element_type=f32), 0.0)

    # ---- 2x2 max-pool, stride 2 ----------------------------------------------
    # h-pair max: 128-aligned 256-lane halves (no sub-vreg strided slices).
    hp = h2.reshape(B * Ho, 2 * WC2)
    rmax = jnp.maximum(hp[:, :WC2], hp[:, WC2:])                 # (B*Ho, W*C2)
    # w-pair max: roll by C2 lanes (XLU); valid values land at even-w lane
    # blocks, odd-w blocks carry junk that hits zero rows of fw1.
    wmax = jnp.maximum(rmax, pltpu.roll(rmax, shift=WC2 - C2, axis=1))
    flat = wmax.reshape(B, Ho * WC2)                             # (B, Ho*W*C2)

    # ---- fc1 + relu, fc2 + sigmoid -------------------------------------------
    z1 = jnp.maximum(
        jnp.dot(flat.astype(bf16), fw1_ref[...], preferred_element_type=f32)
        + fb1_ref[...], 0.0)
    z2 = (jnp.dot(z1.astype(bf16), fw2_ref[...], preferred_element_type=f32)
          + fb2_ref[...])
    out_ref[...] = 1.0 / (1.0 + jnp.exp(-z2))


def prepare_params(w1_oihw, w2_oihw, fc1_w, fc1_b, fc2_w, fc2_b, H, W):
    """One-time parameter repack (off the per-call forward path).

    * Conv weights become row-banded matrices on a (rows=B*H, lanes=(w,c))
      activation layout, with the 3 W-taps AND the 'same' W-padding (clipped
      taps at w=0 / w=W-1) folded in; the 3 H-taps are stacked along K so
      each conv is a single matmul against lane-concatenated shifted slices.
    * fc1 columns are re-ordered from PyTorch's (c, ho, wo) flatten to the
      kernel's (ho, w, c) flatten and expanded to Ho*W*C2 rows with zeros at
      odd-w positions (the in-kernel w-pool leaves valid values at even w).
    * All matmul weights are stored bf16 (kernel accumulates in f32).
    """
    assert H % 2 == 0 and W % 2 == 0, "pooling assumes even H and W"
    w1_np = np.asarray(jax.device_get(w1_oihw), np.float32)   # (C1, Cin, 3, 3)
    w2_np = np.asarray(jax.device_get(w2_oihw), np.float32)   # (C2, C1, 3, 3)
    C1, Cin = w1_np.shape[0], w1_np.shape[1]
    C2 = w2_np.shape[0]
    Ho, Wo = H // 2, W // 2
    nh = int(fc1_w.shape[0])
    no = int(fc2_w.shape[0])

    # Banded conv weights, clipped 'same' W-padding, 3 H-taps stacked along K.
    w1s = np.zeros((3, W * Cin, W * C1), np.float32)
    w2s = np.zeros((3, W * C1, W * C2), np.float32)
    for dh in range(3):
        for kw in range(3):
            blk1 = w1_np[:, :, dh, kw].T        # (Cin, C1)
            blk2 = w2_np[:, :, dh, kw].T        # (C1, C2)
            for wo in range(W):
                wi = wo + kw - 1                # clipped (== zero-pad) at edges
                if 0 <= wi < W:
                    w1s[dh, wi * Cin:(wi + 1) * Cin,
                            wo * C1:(wo + 1) * C1] = blk1
                    w2s[dh, wi * C1:(wi + 1) * C1,
                            wo * C2:(wo + 1) * C2] = blk2
    w1s = w1s.reshape(3 * W * Cin, W * C1)      # dh-major K stacking
    w2s = w2s.reshape(3 * W * C1, W * C2)

    # fc1: PyTorch flatten order (c2, ho, wo) -> kernel order (ho, w, c2) with
    # zero rows at odd w (the un-compacted lanes after the rolled w-pool).
    fc1_np = np.asarray(jax.device_get(fc1_w), np.float32).reshape(nh, C2, Ho, Wo)
    fw1e = np.zeros((Ho * W * C2, nh), np.float32)
    for ho in range(Ho):
        for wo in range(Wo):
            rowbase = (ho * W + 2 * wo) * C2
            fw1e[rowbase:rowbase + C2, :] = fc1_np[:, :, ho, wo].T
    fb1 = np.asarray(jax.device_get(fc1_b), np.float32).reshape(1, nh)
    fw2 = np.asarray(jax.device_get(fc2_w), np.float32).T      # (nh, no)
    fb2 = np.asarray(jax.device_get(fc2_b), np.float32).reshape(1, no)

    bf16 = jnp.bfloat16
    return (jnp.asarray(w1s, dtype=bf16), jnp.asarray(w2s, dtype=bf16),
            jnp.asarray(fw1e, dtype=bf16), jnp.asarray(fb1),
            jnp.asarray(fw2, dtype=bf16), jnp.asarray(fb2))


@jax.jit
def fcnet_forward(x_nchw, params):
    """Per-call forward: one fused layout op + one pallas_call (no grid)."""
    w1s, w2s, fw1e, fb1, fw2, fb2 = params
    B, Cin, H, W = x_nchw.shape
    L0 = W * Cin
    L1 = w1s.shape[1]
    n_out = fw2.shape[1]

    # NCHW -> (B, H, W*Cin), channels-fastest lanes.  No pad here: W-padding
    # is baked into the banded weights, H-padding is handled in-kernel.
    x = jnp.transpose(x_nchw, (0, 2, 3, 1)).reshape(B, H, L0).astype(jnp.float32)

    kernel = functools.partial(fcnet_kernel, B=B, H=H, W=W)
    return pl.pallas_call(
        kernel,
        out_shape=jax.ShapeDtypeStruct((B, n_out), jnp.float32),
        in_specs=[pl.BlockSpec(memory_space=pltpu.MemorySpace.VMEM)] * 7,
        out_specs=pl.BlockSpec(memory_space=pltpu.MemorySpace.VMEM),
        scratch_shapes=[pltpu.VMEM((B, H + 2, L0), jnp.float32),
                        pltpu.VMEM((B, H + 2, L1), jnp.float32)],
    )(x, w1s, w2s, fw1e, fb1, fw2, fb2)


def ref_forward(x_nchw, w1_oihw, w2_oihw, fc1_w, fc1_b, fc2_w, fc2_b):
    """Pure-JAX f32 reference mirroring the PyTorch forward (NCHW)."""
    dn = ('NCHW', 'OIHW', 'NCHW')
    y = lax.conv_general_dilated(x_nchw, w1_oihw, (1, 1), ((1, 1), (1, 1)),
                                 dimension_numbers=dn)
    y = jnp.maximum(y, 0.0)
    y = lax.conv_general_dilated(y, w2_oihw, (1, 1), ((1, 1), (1, 1)),
                                 dimension_numbers=dn)
    y = jnp.maximum(y, 0.0)
    y = lax.reduce_window(y, -jnp.inf, lax.max, (1, 1, 2, 2), (1, 1, 2, 2), 'VALID')
    y = y.reshape(y.shape[0], -1)
    y = jnp.maximum(y @ fc1_w.T + fc1_b, 0.0)
    y = jax.nn.sigmoid(y @ fc2_w.T + fc2_b)
    return y


if __name__ == "__main__":
    key = jax.random.PRNGKey(0)
    ks = jax.random.split(key, 7)

    # FCNet(num=1, in_channels=4, w=8): input NCHW = (2, 4, 16, 16)
    B, Cin, H, W = 2, 4, 16, 16
    C1, C2 = Cin // 2, 16
    wfc = H // 2  # 8 -> fc1 in_features = 8*8*16 = 1024

    x = jax.random.normal(ks[0], (B, Cin, H, W), jnp.float32)
    w1 = jax.random.normal(ks[1], (C1, Cin, 3, 3), jnp.float32) * 0.2     # conv1.weight (OIHW)
    w2 = jax.random.normal(ks[2], (C2, C1, 3, 3), jnp.float32) * 0.2      # conv2.weight (OIHW)
    fc1_w = jax.random.normal(ks[3], (64, wfc * wfc * 16), jnp.float32) * 0.05
    fc1_b = jax.random.normal(ks[4], (64,), jnp.float32) * 0.05
    fc2_w = jax.random.normal(ks[5], (4, 64), jnp.float32) * 0.05
    fc2_b = jax.random.normal(ks[6], (4,), jnp.float32) * 0.05

    # One-time weight repack (not on the per-forward path).
    params = prepare_params(w1, w2, fc1_w, fc1_b, fc2_w, fc2_b, H, W)

    out = jax.block_until_ready(fcnet_forward(x, params))
    ref = ref_forward(x, w1, w2, fc1_w, fc1_b, fc2_w, fc2_b)

    assert out.shape == (B, 4), out.shape
    # bf16 matmul weights/operands vs f32 reference -> relaxed tolerance.
    assert jnp.allclose(out, ref, atol=2e-2, rtol=2e-2), (out, ref)
    print("KERNEL_OK")
</pallas_src>

<mosaic_0001>
module attributes {stable_mosaic.version = 11 : i64} {
  func.func @fcnet_kernel(%arg0: memref<2x16x64xf32, #tpu.memory_space<vmem>>, %arg1: memref<192x32xbf16, #tpu.memory_space<vmem>>, %arg2: memref<96x256xbf16, #tpu.memory_space<vmem>>, %arg3: memref<2048x64xbf16, #tpu.memory_space<vmem>>, %arg4: memref<1x64xf32, #tpu.memory_space<vmem>>, %arg5: memref<64x4xbf16, #tpu.memory_space<vmem>>, %arg6: memref<1x4xf32, #tpu.memory_space<vmem>>, %arg7: memref<2x4xf32, #tpu.memory_space<vmem>>, %arg8: memref<2x18x64xf32, #tpu.memory_space<vmem>>, %arg9: memref<2x18x32xf32, #tpu.memory_space<vmem>>) attributes {dimension_semantics = [], scalar_prefetch = 0 : i64, scratch_operands = 2 : i64, tpu.core_type = #tpu.core_type<tc>} {
    %cst = arith.constant 0.000000e+00 : f32
    %0 = vector.broadcast %cst : f32 to vector<2x1x64xf32>
    %c0 = arith.constant 0 : index
    %c0_0 = arith.constant 0 : index
    %c0_1 = arith.constant 0 : index
    %1 = vector.load %arg8[%c0, %c0_0, %c0_1] : memref<2x18x64xf32, #tpu.memory_space<vmem>>, vector<2x1x64xf32>
    tpu.vector_store %arg8[%c0, %c0_0, %c0_1], %0 {strides = array<i32>} : memref<2x18x64xf32, #tpu.memory_space<vmem>>, vector<2x1x64xf32>,
    %cst_2 = arith.constant 0.000000e+00 : f32
    %2 = vector.broadcast %cst_2 : f32 to vector<2x1x64xf32>
    %c0_3 = arith.constant 0 : index
    %c17 = arith.constant 17 : index
    %c0_4 = arith.constant 0 : index
    %3 = vector.load %arg8[%c0_3, %c17, %c0_4] : memref<2x18x64xf32, #tpu.memory_space<vmem>>, vector<2x1x64xf32>
    tpu.vector_store %arg8[%c0_3, %c17, %c0_4], %2 {strides = array<i32>} : memref<2x18x64xf32, #tpu.memory_space<vmem>>, vector<2x1x64xf32>,
    %c0_5 = arith.constant 0 : index
    %c0_6 = arith.constant 0 : index
    %c0_7 = arith.constant 0 : index
    %4 = vector.load %arg0[%c0_5, %c0_6, %c0_7] : memref<2x16x64xf32, #tpu.memory_space<vmem>>, vector<2x16x64xf32>
    %c0_8 = arith.constant 0 : index
    %c1 = arith.constant 1 : index
    %c0_9 = arith.constant 0 : index
    %5 = vector.load %arg8[%c0_8, %c1, %c0_9] : memref<2x18x64xf32, #tpu.memory_space<vmem>>, vector<2x16x64xf32>
    tpu.vector_store %arg8[%c0_8, %c1, %c0_9], %4 {strides = array<i32>} : memref<2x18x64xf32, #tpu.memory_space<vmem>>, vector<2x16x64xf32>,
    %c0_10 = arith.constant 0 : index
    %c0_11 = arith.constant 0 : index
    %c0_12 = arith.constant 0 : index
    %6 = vector.load %arg8[%c0_10, %c0_11, %c0_12] : memref<2x18x64xf32, #tpu.memory_space<vmem>>, vector<2x16x64xf32>
    %c0_13 = arith.constant 0 : index
    %c1_14 = arith.constant 1 : index
    %c0_15 = arith.constant 0 : index
    %7 = vector.load %arg8[%c0_13, %c1_14, %c0_15] : memref<2x18x64xf32, #tpu.memory_space<vmem>>, vector<2x16x64xf32>
    %c0_16 = arith.constant 0 : index
    %c2 = arith.constant 2 : index
    %c0_17 = arith.constant 0 : index
    %8 = vector.load %arg8[%c0_16, %c2, %c0_17] : memref<2x18x64xf32, #tpu.memory_space<vmem>>, vector<2x16x64xf32>
    %9 = tpu.concatenate %6, %7, %8 in 2 : vector<2x16x64xf32>, vector<2x16x64xf32>, vector<2x16x64xf32> -> vector<2x16x192xf32>
    %10 = vector.shape_cast %9 : vector<2x16x192xf32> to vector<32x192xf32>
    %11 = arith.truncf %10 : vector<32x192xf32> to vector<32x192xbf16>
    %c0_18 = arith.constant 0 : index
    %c0_19 = arith.constant 0 : index
    %12 = vector.load %arg1[%c0_18, %c0_19] : memref<192x32xbf16, #tpu.memory_space<vmem>>, vector<192x32xbf16>
    %cst_20 = arith.constant dense<0.000000e+00> : vector<32x32xf32>
    %13 = tpu.matmul %11, %12, %cst_20 {dimension_numbers = #tpu.dot_dimension_numbers<[1], [0], [0], [1], [0, 0, 1, 1], [], []>} : vector<32x192xbf16>, vector<192x32xbf16>, vector<32x32xf32> -> vector<32x32xf32>
    %cst_21 = arith.constant 0.000000e+00 : f32
    %14 = vector.broadcast %cst_21 : f32 to vector<32x32xf32>
    %15 = arith.maximumf %13, %14 : vector<32x32xf32>
    %cst_22 = arith.constant 0.000000e+00 : f32
    %16 = vector.broadcast %cst_22 : f32 to vector<2x1x32xf32>
    %c0_23 = arith.constant 0 : index
    %c0_24 = arith.constant 0 : index
    %c0_25 = arith.constant 0 : index
    %17 = vector.load %arg9[%c0_23, %c0_24, %c0_25] : memref<2x18x32xf32, #tpu.memory_space<vmem>>, vector<2x1x32xf32>
    tpu.vector_store %arg9[%c0_23, %c0_24, %c0_25], %16 {strides = array<i32>} : memref<2x18x32xf32, #tpu.memory_space<vmem>>, vector<2x1x32xf32>,
    %cst_26 = arith.constant 0.000000e+00 : f32
    %18 = vector.broadcast %cst_26 : f32 to vector<2x1x32xf32>
    %c0_27 = arith.constant 0 : index
    %c17_28 = arith.constant 17 : index
    %c0_29 = arith.constant 0 : index
    %19 = vector.load %arg9[%c0_27, %c17_28, %c0_29] : memref<2x18x32xf32, #tpu.memory_space<vmem>>, vector<2x1x32xf32>
    tpu.vector_store %arg9[%c0_27, %c17_28, %c0_29], %18 {strides = array<i32>} : memref<2x18x32xf32, #tpu.memory_space<vmem>>, vector<2x1x32xf32>,
    %20 = vector.shape_cast %15 : vector<32x32xf32> to vector<2x16x32xf32>
    %c0_30 = arith.constant 0 : index
    %c1_31 = arith.constant 1 : index
    %c0_32 = arith.constant 0 : index
    %21 = vector.load %arg9[%c0_30, %c1_31, %c0_32] : memref<2x18x32xf32, #tpu.memory_space<vmem>>, vector<2x16x32xf32>
    tpu.vector_store %arg9[%c0_30, %c1_31, %c0_32], %20 {strides = array<i32>} : memref<2x18x32xf32, #tpu.memory_space<vmem>>, vector<2x16x32xf32>,
    %c0_33 = arith.constant 0 : index
    %c0_34 = arith.constant 0 : index
    %c0_35 = arith.constant 0 : index
    %22 = vector.load %arg9[%c0_33, %c0_34, %c0_35] : memref<2x18x32xf32, #tpu.memory_space<vmem>>, vector<2x16x32xf32>
    %c0_36 = arith.constant 0 : index
    %c1_37 = arith.constant 1 : index
    %c0_38 = arith.constant 0 : index
    %23 = vector.load %arg9[%c0_36, %c1_37, %c0_38] : memref<2x18x32xf32, #tpu.memory_space<vmem>>, vector<2x16x32xf32>
    %c0_39 = arith.constant 0 : index
    %c2_40 = arith.constant 2 : index
    %c0_41 = arith.constant 0 : index
    %24 = vector.load %arg9[%c0_39, %c2_40, %c0_41] : memref<2x18x32xf32, #tpu.memory_space<vmem>>, vector<2x16x32xf32>
    %25 = tpu.concatenate %22, %23, %24 in 2 : vector<2x16x32xf32>, vector<2x16x32xf32>, vector<2x16x32xf32> -> vector<2x16x96xf32>
    %26 = vector.shape_cast %25 : vector<2x16x96xf32> to vector<32x96xf32>
    %27 = arith.truncf %26 : vector<32x96xf32> to vector<32x96xbf16>
    %c0_42 = arith.constant 0 : index
    %c0_43 = arith.constant 0 : index
    %28 = vector.load %arg2[%c0_42, %c0_43] : memref<96x256xbf16, #tpu.memory_space<vmem>>, vector<96x256xbf16>
    %cst_44 = arith.constant dense<0.000000e+00> : vector<32x256xf32>
    %29 = tpu.matmul %27, %28, %cst_44 {dimension_numbers = #tpu.dot_dimension_numbers<[1], [0], [0], [1], [0, 0, 1, 1], [], []>} : vector<32x96xbf16>, vector<96x256xbf16>, vector<32x256xf32> -> vector<32x256xf32>
    %cst_45 = arith.constant 0.000000e+00 : f32
    %30 = vector.broadcast %cst_45 : f32 to vector<32x256xf32>
    %31 = arith.maximumf %29, %30 : vector<32x256xf32>
    %32 = vector.shape_cast %31 : vector<32x256xf32> to vector<16x512xf32>
    %33 = vector.extract_strided_slice %32 {offsets = [0, 0], sizes = [16, 256], strides = [1, 1]} : vector<16x512xf32> to vector<16x256xf32>
    %34 = vector.extract_strided_slice %32 {offsets = [0, 256], sizes = [16, 256], strides = [1, 1]} : vector<16x512xf32> to vector<16x256xf32>
    %35 = arith.maximumf %33, %34 : vector<16x256xf32>
    %c240_i32 = arith.constant 240 : i32
    %36 = tpu.dynamic_rotate %35 by %c240_i32 dim 1 : vector<16x256xf32>, i32 -> vector<16x256xf32>
    %37 = arith.maximumf %35, %36 : vector<16x256xf32>
    %38 = vector.shape_cast %37 : vector<16x256xf32> to vector<2x2048xf32>
    %39 = arith.truncf %38 : vector<2x2048xf32> to vector<2x2048xbf16>
    %c0_46 = arith.constant 0 : index
    %c0_47 = arith.constant 0 : index
    %40 = vector.load %arg3[%c0_46, %c0_47] : memref<2048x64xbf16, #tpu.memory_space<vmem>>, vector<2048x64xbf16>
    %cst_48 = arith.constant dense<0.000000e+00> : vector<2x64xf32>
    %41 = tpu.matmul %39, %40, %cst_48 {dimension_numbers = #tpu.dot_dimension_numbers<[1], [0], [0], [1], [0, 0, 1, 1], [], []>} : vector<2x2048xbf16>, vector<2048x64xbf16>, vector<2x64xf32> -> vector<2x64xf32>
    %c0_49 = arith.constant 0 : index
    %c0_50 = arith.constant 0 : index
    %42 = vector.load %arg4[%c0_49, %c0_50] : memref<1x64xf32, #tpu.memory_space<vmem>>, vector<1x64xf32>
    %43 = vector.broadcast %42 : vector<1x64xf32> to vector<2x64xf32>
    %44 = arith.addf %41, %43 : vector<2x64xf32>
    %cst_51 = arith.constant 0.000000e+00 : f32
    %45 = vector.broadcast %cst_51 : f32 to vector<2x64xf32>
    %46 = arith.maximumf %44, %45 : vector<2x64xf32>
    %47 = arith.truncf %46 : vector<2x64xf32> to vector<2x64xbf16>
    %c0_52 = arith.constant 0 : index
    %c0_53 = arith.constant 0 : index
    %48 = vector.load %arg5[%c0_52, %c0_53] : memref<64x4xbf16, #tpu.memory_space<vmem>>, vector<64x4xbf16>
    %cst_54 = arith.constant dense<0.000000e+00> : vector<2x4xf32>
    %49 = tpu.matmul %47, %48, %cst_54 {dimension_numbers = #tpu.dot_dimension_numbers<[1], [0], [0], [1], [0, 0, 1, 1], [], []>} : vector<2x64xbf16>, vector<64x4xbf16>, vector<2x4xf32> -> vector<2x4xf32>
    %c0_55 = arith.constant 0 : index
    %c0_56 = arith.constant 0 : index
    %50 = vector.load %arg6[%c0_55, %c0_56] : memref<1x4xf32, #tpu.memory_space<vmem>>, vector<1x4xf32>
    %51 = vector.broadcast %50 : vector<1x4xf32> to vector<2x4xf32>
    %52 = arith.addf %49, %51 : vector<2x4xf32>
    %cst_57 = arith.constant 0.000000e+00 : f32
    %53 = vector.broadcast %cst_57 : f32 to vector<2x4xf32>
    %54 = arith.subf %53, %52 : vector<2x4xf32>
    %55 = math.exp %54 : vector<2x4xf32>
    %cst_58 = arith.constant 1.000000e+00 : f32
    %56 = vector.broadcast %cst_58 : f32 to vector<2x4xf32>
    %57 = arith.addf %56, %55 : vector<2x4xf32>
    %cst_59 = arith.constant 1.000000e+00 : f32
    %58 = vector.broadcast %cst_59 : f32 to vector<2x4xf32>
    %59 = arith.divf %58, %57 : vector<2x4xf32>
    %c0_60 = arith.constant 0 : index
    %c0_61 = arith.constant 0 : index
    %60 = vector.load %arg7[%c0_60, %c0_61] : memref<2x4xf32, #tpu.memory_space<vmem>>, vector<2x4xf32>
    tpu.vector_store %arg7[%c0_60, %c0_61], %59 {strides = array<i32>} : memref<2x4xf32, #tpu.memory_space<vmem>>, vector<2x4xf32>,
    return
  }
}

</mosaic_0001>

<bundles_post_ra>
// kernel: fcnet_forward.1
= control target key start
LH: loop header
LB: loop body
LE: loop exit
PB: predicated region body
PF: predicated region fallthrough
CT: control target
= control target key end

     0   :  { %vm37_vm0 = vcmask 523264   ;;  %v2917_v4 = vmov 0   ;;  %vm28_vm1 = vcmask 516096   ;;  %v2918_v6 = vmov 0.0   ;;  %s2919_s14 = smov 64   ;;  %s3620_s0 = inlined_call_operand.vmem [shape: f32[2,16,64], index: 0, kind: input, shape index: {}]   ;;  %s3621_s1 = inlined_call_operand.vmem [shape: bf16[192,32], index: 1, kind: input, shape index: {}]   ;;  %s3622_s2 = inlined_call_operand.vmem [shape: bf16[96,256], index: 2, kind: input, shape index: {}]   ;;  %s3623_s3 = inlined_call_operand.vmem [shape: bf16[2048,64], index: 3, kind: input, shape index: {}]   ;;  %s3624_s4 = inlined_call_operand.vmem [shape: f32[1,64], index: 4, kind: input, shape index: {}]   ;;  %s3625_s5 = inlined_call_operand.vmem [shape: bf16[64,4], index: 5, kind: input, shape index: {}]   ;;  %s3626_s6 = inlined_call_operand.vmem [shape: f32[1,4], index: 6, kind: input, shape index: {}]   ;;  %s3627_s7 = inlined_call_operand.hbm [shape: f32[2,4], index: 7, kind: output, shape index: {}]  }
   0x1   :  { %v33_v0 = vld [vmem:[%s3620_s0] sm:$0xff]  ;;  %v34_v1 = vld [vmem:[%s3620_s0 + $0x8] sm:$0xff]  ;;  %v35_v2 = vld [vmem:[%s3620_s0 + $0x10] sm:$0xff]  ;;  %180 = vmatprep.subr.bf16.mxu0 %v2917_v4  ;;  %408 = vmatprep.mubr.bf16.mxu1 %v2917_v4  ;;  %31 = vst.msk [vmem:[#allocation2 + $0x11] sm:$0x1] %vm28_vm1, %v2918_v6 }
   0x2   :  { %38 = vst.msk [vmem:[#allocation2 + $0x1] sm:$0xff] %vm37_vm0, %v33_v0  ;;  %39 = vst.msk [vmem:[#allocation2 + $0x9] sm:$0xff] %vm37_vm0, %v34_v1  ;;  %v36_v3 = vld [vmem:[%s3620_s0 + $0x18] sm:$0xff]  ;;  %v2730_v7 = vld [vmem:[%s3621_s1 + $0x30] sm:$0xff]  }
   0x3   :  { %40 = vst.msk [vmem:[#allocation2 + $0x19] sm:$0xff] %vm37_vm0, %v35_v2  ;;  %41 = vst.msk [vmem:[#allocation2 + $0x21] sm:$0xff] %vm37_vm0, %v36_v3  ;;  %v2729_v5 = vld [vmem:[%s3621_s1 + $0x38] sm:$0xff]   ;;  %v2731_v8 = vld [vmem:[%s3621_s1 + $0x28] sm:$0xff]  }
   0x4   :  { %29 = vst.msk [vmem:[#allocation2] sm:$0x1] %vm28_vm1, %v2918_v6  ;;  %30 = vst.msk [vmem:[#allocation2 + $0x18] sm:$0x1] %vm28_vm1, %v2918_v6  ;;  %181 = vmatpush1.bf16.msra.mxu0 %v2729_v5  ;;  %v2732_v15 = vld [vmem:[%s3621_s1 + $0x20] sm:$0xff]   ;;  %v2733_v18 = vld [vmem:[%s3621_s1 + $0x18] sm:$0xff]  }
   0x5   :  { %32 = vst.msk [vmem:[#allocation2 + $0x29] sm:$0x1] %vm28_vm1, %v2918_v6  ;;  %182 = vmatprep.subr.bf16.mxu0 %v2917_v4  ;;  %v2734_v20 = vld [vmem:[%s3621_s1 + $0x10] sm:$0xff]   ;;  %v2735_v21 = vld [vmem:[%s3621_s1 + $0x8] sm:$0xff]   ;;  %v2736_v22 = vld [vmem:[%s3621_s1] sm:$0xff]  }
   0x6   :  { %v2737_v23 = vld [vmem:[%s3621_s1 + $0x58] sm:$0xff]   ;;  %v2738_v24 = vld [vmem:[%s3621_s1 + $0x50] sm:$0xff]   ;;  %v2739_v25 = vld [vmem:[%s3621_s1 + $0x48] sm:$0xff]  }
   0x7   :  { %v2740_v26 = vld [vmem:[%s3621_s1 + $0x40] sm:$0xff]  }
   0x8   :  { %183 = vmatpush1.bf16.msra.mxu0 %v2730_v7 }
   0x9   :  { %v46_v9 = vld [vmem:[#allocation2 + $0x1] sm:$0xff]  ;;  %v47_v10 = vld [vmem:[#allocation2 + $0x9] sm:$0xff]  ;;  %184 = vmatprep.subr.bf16.mxu0 %v2917_v4 }
   0xa   :  { %v48_v11 = vld [vmem:[#allocation2 + $0x19] sm:$0xff]  ;;  %v2699_v12 = vpack.i.bf16 %v47_v10, %v46_v9  ;;  %v49_v13 = vld [vmem:[#allocation2 + $0x21] sm:$0xff]  ;;  %v51_v17 = vld [vmem:[#allocation2 + $0xa] sm:$0xff] }
   0xb   :  { %v2704_v14 = vpack.i.bf16 %v49_v13, %v48_v11  ;;  %v50_v16 = vld [vmem:[#allocation2 + $0x2] sm:$0xff] }
   0xc   :  { %2700 = vrot.lane.b32.xlu0 %v2699_v12, %s2919_s14  ;;  %185 = vmatpush1.bf16.msra.mxu0 %v2731_v8  ;;  %v75_v19 = vpack.c.bf16 %v51_v17, %v50_v16 }
   0xd   :  { %186 = vmatprep.subr.bf16.mxu0 %v2917_v4 }
   0xe   :  { %2345 = vmatprep.mubr.msk.bf16.mxu0 %vm37_vm0, %v75_v19 }
  0x10   :  { %2705 = vrot.lane.b32.xlu0 %v2704_v14, %s2919_s14  ;;  %187 = vmatpush1.bf16.msra.mxu0 %v2732_v15 }
  0x11   :  { %188 = vmatprep.subr.bf16.mxu0 %v2917_v4 }
  0x14   :  { %189 = vmatpush1.bf16.msra.mxu0 %v2733_v18 }
  0x15   :  { %190 = vmatprep.subr.bf16.mxu0 %v2917_v4 }
  0x18   :  { %191 = vmatpush1.bf16.msra.mxu0 %v2734_v20 }
  0x19   :  { %192 = vmatprep.subr.bf16.mxu0 %v2917_v4 }
  0x1c   :  { %193 = vmatpush1.bf16.msra.mxu0 %v2735_v21 }
  0x1d   :  { %194 = vmatprep.subr.bf16.mxu0 %v2917_v4 }
  0x20   :  { %195 = vmatpush1.bf16.msra.mxu0 %v2736_v22 }
  0x21   :  { %204 = vmatprep.subr.bf16.mxu0 %v2917_v4 }
  0x24   :  { %205 = vmatpush2.bf16.msra.mxu0 %v2737_v23 }
  0x25   :  { %206 = vmatprep.subr.bf16.mxu0 %v2917_v4 }
  0x28   :  { %207 = vmatpush2.bf16.msra.mxu0 %v2738_v24 }
  0x29   :  { %208 = vmatprep.subr.bf16.mxu0 %v2917_v4 }
  0x2c   :  { %209 = vmatpush2.bf16.msra.mxu0 %v2739_v25 }
  0x2d   :  { %210 = vmatprep.subr.bf16.mxu0 %v2917_v4 }
  0x30   :  { %211 = vmatpush2.bf16.msra.mxu0 %v2740_v26 }
  0x31   :  { %12 = vsyncpa [#allocation5], 0  ;;  %v42_v27 = vld [vmem:[#allocation2] sm:$0xff]  ;;  %v43_v29 = vld [vmem:[#allocation2 + $0x8] sm:$0xff]  ;;  %vm233_vm2 = vcmask 253952   ;;  %vm238_vm3 = vcmask 261120  }
  0x32   :  { %v52_v30 = vld [vmem:[#allocation2 + $0x1a] sm:$0xff]  ;;  %v53_v31 = vld [vmem:[#allocation2 + $0x22] sm:$0xff]  ;;  %236 = vst.msk [vmem:[#allocation3 + $0x11] sm:$0x1] %vm233_vm2, %v2918_v6  ;;  %234 = vst.msk [vmem:[#allocation3] sm:$0x1] %vm233_vm2, %v2918_v6 }
  0x33   :  { %v77_v36 = vpack.c.bf16 %v53_v31, %v52_v30  ;;  %v44_v39 = vld [vmem:[#allocation2 + $0x18] sm:$0xff]  ;;  %v45_v40 = vld [vmem:[#allocation2 + $0x20] sm:$0xff]  ;;  %235 = vst.msk [vmem:[#allocation3 + $0x18] sm:$0x1] %vm233_vm2, %v2918_v6  ;;  %237 = vst.msk [vmem:[#allocation3 + $0x29] sm:$0x1] %vm233_vm2, %v2918_v6 }
  0x34   :  { %v2741_v46 = vld [vmem:[%s3622_s2 + $0x54] ss:$8 sps:$4 sm:$0xff]   ;;  %v2743_v47 = vld [vmem:[%s3622_s2 + $0x50] ss:$8 sps:$4 sm:$0xff]   ;;  %v2744_v48 = vld [vmem:[%s3622_s2 + $0x44] ss:$8 sps:$4 sm:$0xff]  }
  0x35   :  { %380 = vmatprep.subr.bf16.mxu1 %v2741_v46  ;;  %v2746_v49 = vld [vmem:[%s3622_s2 + $0x40] ss:$8 sps:$4 sm:$0xff]   ;;  %v2747_v50 = vld [vmem:[%s3622_s2 + $0x34] ss:$8 sps:$4 sm:$0xff]   ;;  %v2749_v51 = vld [vmem:[%s3622_s2 + $0x30] ss:$8 sps:$4 sm:$0xff]  }
  0x36   :  { %381 = vmatpush1.bf16.msra.mxu1 %v2743_v47  ;;  %v2750_v52 = vld [vmem:[%s3622_s2 + $0x24] ss:$8 sps:$4 sm:$0xff]   ;;  %v2752_v53 = vld [vmem:[%s3622_s2 + $0x20] ss:$8 sps:$4 sm:$0xff]   ;;  %v2753_v58 = vld [vmem:[%s3622_s2 + $0x14] ss:$8 sps:$4 sm:$0xff]  }
  0x37   :  { %382 = vmatprep.subr.bf16.mxu1 %v2744_v48  ;;  %v2755_v60 = vld [vmem:[%s3622_s2 + $0x10] ss:$8 sps:$4 sm:$0xff]   ;;  %v2756_v63 = vld [vmem:[%s3622_s2 + $0x4] ss:$8 sps:$4 sm:$0xff]   ;;  %v2758_v1 = vld [vmem:[%s3622_s2] ss:$8 sps:$4 sm:$0xff]   ;;  %v464_v48 = vlaneseq }
  0x38   :  { %s2920_s1 = smov 32   ;;  %vm369_vm4 = vcmask 785408   ;;  %v2921_v46 = vmov 1966171168   ;;  %s2923_s26 = smov 112   ;;  %vm2925_vm6 = vmmov 0  }
  0x39   :  { %v462_v47 = vunpack.c.l.s4 %v2921_v46  ;;  %s2926_s13 = smov [#allocation4]   ;;  %vm2317_vm7 = vcmask 25600  }
  0x3a   :  { %383 = vmatpush1.bf16.msra.mxu1 %v2746_v49  ;;  %s2325_s15 = sshll.u32 %s2926_s13, 4  ;;  %s2326_s15 = int_to_ptr.vmem [resolvable:$true] %s2325_s15 }
  0x3b   :  { %384 = vmatprep.subr.bf16.mxu1 %v2747_v50  ;;  %v463_v49 = vunpack.c.0.s8 %v462_v47  ;;  %v3102_v50 = vshrl.u32 %v464_v48, 7  ;;  %v2765_v47 = vld [vmem:[%s3623_s3 + $0xf0] sm:$0xff]   ;;  %s2895_s16 = scalar_lea.vmem %s2326_s15, 32  ;;  %p2900_p1 = scmp.lt.s32.totalorder %s2326_s15, %s2326_s15 }
  0x3c   :  { %p2896_p0 = scmp.ne.s32.totalorder %s2326_s15, %s2895_s16  ;;  %p2901_p2 = scmp.lt.s32.totalorder %s2895_s16, %s2895_s16 }
  0x3e   :  { %385 = vmatpush1.bf16.msra.mxu1 %v2749_v51  ;;  %p2902_p3 = por %p2901_p2, %p2900_p1 }
  0x3f   :  { %386 = vmatprep.subr.bf16.mxu1 %v2750_v52 }
  0x40   :  { %p2903_p4 = pnand %p2902_p3, %p2896_p0 }
  0x42   :  { %387 = vmatpush1.bf16.msra.mxu1 %v2752_v53 }
  0x43   :  { %388 = vmatprep.subr.bf16.mxu1 %v2753_v58 }
  0x46   :  { %389 = vmatpush1.bf16.msra.mxu1 %v2755_v60 }
  0x47   :  { %390 = vmatprep.subr.bf16.mxu1 %v2756_v63 }
  0x4a   :  { %391 = vmatpush1.bf16.msra.mxu1 %v2758_v1 }
  0x7e   :  { %v2701_v28 = vpop.permute.xlu0 %2700 }
  0x7f   :  { %v2703_v32 = vunpack.i.h.bf16 %v2701_v28  ;;  %v2702_v33 = vunpack.i.l.bf16 %v2701_v28 }
  0x81   :  { %v70_v34 = vsel %vm37_vm0, %v42_v27, %v2702_v33  ;;  %v71_v35 = vsel %vm37_vm0, %v43_v29, %v2703_v32 }
  0x82   :  { %v74_v37 = vpack.c.bf16 %v71_v35, %v70_v34  ;;  %v2706_v38 = vpop.permute.xlu0 %2705 }
  0x83   :  { %v2708_v41 = vunpack.i.h.bf16 %v2706_v38  ;;  %v2707_v42 = vunpack.i.l.bf16 %v2706_v38 }
  0x84   :  { %213 = vmatmul.mubr.bf16.vlgmr.msra.gmra.mxu0 %v74_v37 }
  0x85   :  { %2346 = vmatprep.mubr.msk.bf16.mxu0 %vm37_vm0, %v77_v36  ;;  %v72_v43 = vsel %vm37_vm0, %v44_v39, %v2707_v42  ;;  %v73_v44 = vsel %vm37_vm0, %v45_v40, %v2708_v41 }
  0x86   :  { %v76_v45 = vpack.c.bf16 %v73_v44, %v72_v43 }
  0x8c   :  { %221 = vmatmul.mubr.bf16.gmra.mxu0 %v76_v45 }
 0x144   :  { %v214_v54 = vpop.f32.mrf.mxu0 }
 0x145   :  { %v229_v55 = vmax.f32 %v214_v54, 0.0 }
 0x146   :  { %v216_v56 = vpop.f32.mrf.mxu0 }
 0x147   :  { %239 = vst.msk [vmem:[#allocation3 + $0x1] sm:$0xff] %vm238_vm3, %v229_v55 }
 0x148   :  { %v217_v57 = vpop.f32.mrf.mxu0 }
 0x149   :  { %v230_v59 = vmax.f32 %v217_v57, 0.0 }
 0x14a   :  { %v219_v61 = vpop.f32.mrf.mxu0 }
 0x14b   :  { %240 = vst.msk [vmem:[#allocation3 + $0x9] sm:$0xff] %vm238_vm3, %v230_v59  ;;  %v2922_v59 = vmov 1983009808  }
 0x14c   :  { %v222_v62 = vpop.f32.mrf.mxu0  ;;  %v560_v60 = vunpack.c.l.s4 %v2922_v59  ;;  %v2769_v59 = vld [vmem:[%s3623_s3 + $0xe8] sm:$0xff]  }
 0x14d   :  { %v231_v0 = vmax.f32 %v222_v62, 0.0 }
 0x14e   :  { %v224_v2 = vpop.f32.mrf.mxu0  ;;  %v247_v8 = vld [vmem:[#allocation3 + $0x1] sm:$0xff] }
 0x14f   :  { %241 = vst.msk [vmem:[#allocation3 + $0x19] sm:$0xff] %vm238_vm3, %v231_v0  ;;  %v243_v24 = vld [vmem:[#allocation3] sm:$0xff] }
 0x150   :  { %v225_v3 = vpop.f32.mrf.mxu0 }
 0x151   :  { %v232_v5 = vmax.f32 %v225_v3, 0.0 }
 0x152   :  { %v227_v7 = vpop.f32.mrf.mxu0  ;;  %v248_v9 = vld [vmem:[#allocation3 + $0x9] sm:$0xff] }
 0x153   :  { %242 = vst.msk [vmem:[#allocation3 + $0x21] sm:$0xff] %vm238_vm3, %v232_v5  ;;  %v2709_v10 = vpack.i.bf16 %v248_v9, %v247_v8  ;;  %v251_v11 = vld [vmem:[#allocation3 + $0x2] sm:$0xff]  ;;  %v252_v12 = vld [vmem:[#allocation3 + $0xa] sm:$0xff]  ;;  %v561_v9 = vunpack.c.0.s8 %v560_v60 }
 0x154   :  { %v2714_v13 = vpack.i.bf16 %v252_v12, %v251_v11  ;;  %v244_v25 = vld [vmem:[#allocation3 + $0x8] sm:$0xff] }
 0x155   :  { %2710 = vrot.lane.b32.xlu1 %v2709_v10, %s2920_s1 }
 0x156   :  { %v249_v14 = vld [vmem:[#allocation3 + $0x19] sm:$0xff] }
 0x157   :  { %v245_v39 = vld [vmem:[#allocation3 + $0x18] sm:$0xff] }
 0x159   :  { %2715 = vrot.lane.b32.xlu1 %v2714_v13, %s2919_s14 }
 0x15a   :  { %v253_v15 = vld [vmem:[#allocation3 + $0x1a] sm:$0xff]  ;;  %v254_v16 = vld [vmem:[#allocation3 + $0x22] sm:$0xff] }
 0x15b   :  { %v250_v17 = vld [vmem:[#allocation3 + $0x21] sm:$0xff]  ;;  %v2724_v18 = vpack.i.bf16 %v254_v16, %v253_v15 }
 0x15c   :  { %v2719_v19 = vpack.i.bf16 %v250_v17, %v249_v14  ;;  %v246_v40 = vld [vmem:[#allocation3 + $0x20] sm:$0xff] }
 0x15d   :  { %2725 = vrot.lane.b32.xlu1 %v2724_v18, %s2919_s14 }
 0x15e   :  { %2720 = vrot.lane.b32.xlu0 %v2719_v19, %s2920_s1 }
 0x1c7   :  { %v2711_v20 = vpop.permute.xlu1 %2710 }
 0x1c8   :  { %v2713_v21 = vunpack.i.h.bf16 %v2711_v20  ;;  %v2712_v22 = vunpack.i.l.bf16 %v2711_v20 }
 0x1ca   :  { %v287_v28 = vsel %vm238_vm3, %v243_v24, %v2712_v22  ;;  %v288_v29 = vsel %vm238_vm3, %v244_v25, %v2713_v21  ;;  %v2759_v24 = vld [vmem:[%s3623_s3 + $0x78] sm:$0xff]  }
 0x1cb   :  { %v2716_v23 = vpop.permute.xlu1 %2715  ;;  %2496 = vmatprep.subr.bf16.mxu1 %v2759_v24  ;;  %v2786_v24 = vld [vmem:[%s3623_s3 + $0x88] sm:$0xff]  }
 0x1cc   :  { %v2718_v26 = vunpack.i.h.bf16 %v2716_v23  ;;  %v2717_v27 = vunpack.i.l.bf16 %v2716_v23  ;;  %v3116_v23 = vsub.s32 %v561_v9, %v3102_v50  ;;  %v2776_v9 = vld [vmem:[%s3623_s3 + $0x18] sm:$0xff]  }
 0x1ce   :  { %v291_v30 = vsel %vm37_vm0, %v287_v28, %v2717_v27  ;;  %v292_v31 = vsel %vm37_vm0, %v288_v29, %v2718_v26  ;;  %v2760_v29 = vld [vmem:[%s3623_s3 + $0x38] sm:$0xff]  }
 0x1cf   :  { %v295_v32 = vpack.c.bf16 %v292_v31, %v291_v30  ;;  %v2726_v33 = vpop.permute.xlu1 %2725 }
 0x1d0   :  { %v2721_v34 = vpop.permute.xlu0 %2720  ;;  %v2728_v35 = vunpack.i.h.bf16 %v2726_v33  ;;  %v2727_v36 = vunpack.i.l.bf16 %v2726_v33 }
 0x1d1   :  { %v2723_v37 = vunpack.i.h.bf16 %v2721_v34  ;;  %v2722_v38 = vunpack.i.l.bf16 %v2721_v34  ;;  %2359 = vmatmul.mubr.msk.bf16.vlgmr.msra.gmra.mxu1 %vm369_vm4, %v295_v32  ;;  %v2761_v32 = vld [vmem:[%s3623_s3 + $0xf8] sm:$0xff]  }
 0x1d2   :  { %418 = vmatprep.mubr.bf16.mxu1 %v2917_v4  ;;  %v3105_v4 = vsub.s32 %v463_v49, %v3102_v50  ;;  %2497 = vmatpush3.bf16.msra.mxu1 %v2760_v29  ;;  %v2790_v29 = vld [vmem:[%s3623_s3 + $0x80] sm:$0xff]  }
 0x1d3   :  { %v289_v41 = vsel %vm238_vm3, %v245_v39, %v2722_v38  ;;  %v290_v42 = vsel %vm238_vm3, %v246_v40, %v2723_v37  ;;  %2518 = vmatprep.subr.bf16.mxu0 %v2761_v32  ;;  %v2763_v39 = vld [vmem:[%s3623_s3 + $0x70] sm:$0xff]   ;;  %v606_v32 = vand.u32 127, %v464_v48 }
 0x1d4   :  { %v293_v43 = vsel %vm37_vm0, %v289_v41, %v2727_v36  ;;  %v294_v44 = vsel %vm37_vm0, %v290_v42, %v2728_v35  ;;  %v2762_v36 = vld [vmem:[%s3623_s3 + $0xb8] sm:$0xff]   ;;  %2498 = vmatprep.subr.bf16.mxu1 %v2763_v39 }
 0x1d5   :  { %v296_v45 = vpack.c.bf16 %v294_v44, %v293_v43  ;;  %2519 = vmatpush3.bf16.msra.mxu0 %v2762_v36  ;;  %v2764_v44 = vld [vmem:[%s3623_s3 + $0x30] sm:$0xff]   ;;  %vm607_vm5 = vcmp.lt.s32.totalorder %v606_v32, 112 }
 0x1d6   :  { %2499 = vmatpush3.bf16.msra.mxu1 %v2764_v44  ;;  %2520 = vmatprep.subr.bf16.mxu0 %v2765_v47  ;;  %v2924_v44 = vmov 1935823168   ;;  %v2797_v32 = vld [vmem:[%s3623_s3 + $0x1f0] sm:$0xff]  }
 0x1d7   :  { %v713_v47 = vunpack.c.l.s4 %v2924_v44 }
 0x1d9   :  { %2360 = vmatmul.mubr.msk.bf16.gmra.mxu1 %vm369_vm4, %v296_v45 }
 0x291   :  { %v410_v51 = vpop.f32.mrf.mxu1 }
 0x292   :  { %v429_v53 = vmax.f32 %v410_v51, 0.0 }
 0x293   :  { %v412_v52 = vpop.f32.mrf.mxu1 }
 0x294   :  { %v430_v54 = vmax.f32 %v412_v52, 0.0 }
 0x295   :  { %v414_v55 = vpop.f32.mrf.mxu1 }
 0x296   :  { %v445_v56 = vcombine.low %v429_v53, %v430_v54  ;;  %v446_v57 = vcombine.high %v429_v53, %v430_v54  ;;  %v431_v63 = vmax.f32 %v414_v55, 0.0  ;;  %v2766_v53 = vld [vmem:[%s3623_s3 + $0xb0] sm:$0xff]   ;;  %v2767_v54 = vld [vmem:[%s3623_s3 + $0x68] sm:$0xff]  }
 0x297   :  { %v416_v58 = vpop.f32.mrf.mxu1  ;;  %2521 = vmatpush3.bf16.msra.mxu0 %v2766_v53  ;;  %2500 = vmatprep.subr.bf16.mxu1 %v2767_v54  ;;  %v714_v53 = vunpack.c.0.s8 %v713_v47  ;;  %v2804_v47 = vld [vmem:[%s3623_s3 + $0x120] sm:$0xff]  }
 0x298   :  { %v467_v61 = vrot.slane %v445_v56, %v3105_v4  ;;  %v474_v62 = vrot.slane %v446_v57, %v3105_v4  ;;  %v432_v0 = vmax.f32 %v416_v58, 0.0  ;;  %v2768_v58 = vld [vmem:[%s3623_s3 + $0x28] sm:$0xff]   ;;  %2522 = vmatprep.subr.bf16.mxu0 %v2769_v59 }
 0x299   :  { %v420_v1 = vpop.f32.mrf.mxu1  ;;  %2501 = vmatpush3.bf16.msra.mxu1 %v2768_v58 }
 0x29a   :  { %v525_v2 = vrot.slane %v467_v61, 4  ;;  %v526_v3 = vrot.slane %v474_v62, 4  ;;  %v447_v5 = vcombine.low %v431_v63, %v432_v0  ;;  %v448_v7 = vcombine.high %v431_v63, %v432_v0  ;;  %v2771_v63 = vld [vmem:[%s3623_s3 + $0x60] sm:$0xff]  }
 0x29b   :  { %v422_v8 = vpop.f32.mrf.mxu1  ;;  %v433_v14 = vmax.f32 %v420_v1, 0.0  ;;  %2502 = vmatprep.subr.bf16.mxu1 %v2771_v63 }
 0x29c   :  { %v3109_v10 = vmax.f32 %v467_v61, %v525_v2  ;;  %v3111_v11 = vmax.f32 %v474_v62, %v526_v3  ;;  %v481_v12 = vrot.slane %v447_v5, %v3105_v4  ;;  %v488_v13 = vrot.slane %v448_v7, %v3105_v4  ;;  %v2770_v62 = vld [vmem:[%s3623_s3 + $0xa8] sm:$0xff]   ;;  %v2772_v2 = vld [vmem:[%s3623_s3 + $0x20] sm:$0xff]  }
 0x29d   :  { %v434_v15 = vmax.f32 %v422_v8, 0.0  ;;  %v424_v16 = vpop.f32.mrf.mxu1  ;;  %2523 = vmatpush3.bf16.msra.mxu0 %v2770_v62  ;;  %v2773_v3 = vld [vmem:[%s3623_s3 + $0xe0] sm:$0xff]   ;;  %2503 = vmatpush3.bf16.msra.mxu1 %v2772_v2  ;;  %v2775_v8 = vld [vmem:[%s3623_s3 + $0x58] sm:$0xff]  }
 0x29e   :  { %v527_v17 = vrot.slane %v481_v12, 4  ;;  %v528_v18 = vrot.slane %v488_v13, 4  ;;  %v435_v21 = vmax.f32 %v424_v16, 0.0  ;;  %v557_v28 = vcombine.low %v3109_v10, %v3111_v11  ;;  %v2774_v7 = vld [vmem:[%s3623_s3 + $0xa0] sm:$0xff]   ;;  %2524 = vmatprep.subr.bf16.mxu0 %v2773_v3  ;;  %2504 = vmatprep.subr.bf16.mxu1 %v2775_v8  ;;  %v2780_v16 = vld [vmem:[%s3623_s3 + $0x10] sm:$0xff]  }
 0x29f   :  { %v449_v19 = vcombine.low %v433_v14, %v434_v15  ;;  %v450_v20 = vcombine.high %v433_v14, %v434_v15  ;;  %v426_v22 = vpop.f32.mrf.mxu1  ;;  %v2778_v14 = vld [vmem:[%s3623_s3 + $0x98] sm:$0xff]   ;;  %v2779_v15 = vld [vmem:[%s3623_s3 + $0x50] sm:$0xff]  }
 0x2a0   :  { %v3121_v25 = vmax.f32 %v481_v12, %v527_v17  ;;  %v3123_v26 = vmax.f32 %v488_v13, %v528_v18  ;;  %v436_v27 = vmax.f32 %v426_v22, 0.0  ;;  %v565_v42 = vrot.slane %v557_v28, %v3116_v23  ;;  %v2777_v12 = vld [vmem:[%s3623_s3 + $0xd8] sm:$0xff]   ;;  %v2781_v17 = vld [vmem:[%s3623_s3 + $0xd0] sm:$0xff]   ;;  %v2787_v22 = vld [vmem:[%s3623_s3 + $0x40] sm:$0xff]  }
 0x2a1   :  { %v495_v30 = vrot.slane %v449_v19, %v3105_v4  ;;  %v502_v31 = vrot.slane %v450_v20, %v3105_v4  ;;  %2525 = vmatpush3.bf16.msra.mxu0 %v2774_v7  ;;  %2505 = vmatpush3.bf16.msra.mxu1 %v2776_v9  ;;  %v2782_v18 = vld [vmem:[%s3623_s3 + $0x90] sm:$0xff]   ;;  %v2783_v19 = vld [vmem:[%s3623_s3 + $0x48] sm:$0xff]   ;;  %v2788_v28 = vld [vmem:[%s3623_s3] sm:$0xff]  }
 0x2a2   :  { %v451_v33 = vcombine.low %v435_v21, %v436_v27  ;;  %v452_v34 = vcombine.high %v435_v21, %v436_v27  ;;  %v558_v35 = vcombine.low %v3121_v25, %v3123_v26  ;;  %2526 = vmatprep.subr.bf16.mxu0 %v2777_v12  ;;  %2506 = vmatprep.subr.bf16.mxu1 %v2779_v15  ;;  %v2785_v20 = vld [vmem:[%s3623_s3 + $0xc8] sm:$0xff]   ;;  %v2789_v27 = vld [vmem:[%s3623_s3 + $0xc0] sm:$0xff]  }
 0x2a3   :  { %v529_v37 = vrot.slane %v495_v30, 4  ;;  %v530_v38 = vrot.slane %v502_v31, 4  ;;  %v2784_v21 = vld [vmem:[%s3623_s3 + $0x8] sm:$0xff]  }
 0x2a4   :  { %v509_v40 = vrot.slane %v451_v33, %v3105_v4  ;;  %v516_v41 = vrot.slane %v452_v34, %v3105_v4  ;;  %v572_v43 = vrot.slane %v558_v35, %v3116_v23 }
 0x2a5   :  { %v3150_v45 = vmax.f32 %v495_v30, %v529_v37  ;;  %v3152_v46 = vmax.f32 %v502_v31, %v530_v38  ;;  %2527 = vmatpush3.bf16.msra.mxu0 %v2778_v14  ;;  %2507 = vmatpush3.bf16.msra.mxu1 %v2780_v16  ;;  %v2791_v30 = vld [vmem:[%s3623_s3 + $0x178] sm:$0xff]  }
 0x2a6   :  { %v531_v49 = vrot.slane %v509_v40, 4  ;;  %v532_v51 = vrot.slane %v516_v41, 4  ;;  %v573_v52 = vcombine.low %v565_v42, %v572_v43  ;;  %v574_v60 = vcombine.high %v565_v42, %v572_v43  ;;  %2528 = vmatprep.subr.bf16.mxu0 %v2781_v17  ;;  %2508 = vmatprep.subr.bf16.mxu1 %v2783_v19  ;;  %v2793_v31 = vld [vmem:[%s3623_s3 + $0x1f8] sm:$0xff]  }
 0x2a7   :  { %v575_v57 = vcombine.low %v3150_v45, %v3152_v46  ;;  %v2792_v19 = vld [vmem:[%s3623_s3 + $0x138] sm:$0xff]  }
 0x2a8   :  { %v3163_v55 = vmax.f32 %v509_v40, %v531_v49  ;;  %v3165_v56 = vmax.f32 %v516_v41, %v532_v51  ;;  %597 = vrot.lane.b32.xlu0 %v573_v52, %s2923_s26 }
 0x2a9   :  { %v583_v0 = vrot.slane %v575_v57, %v3116_v23  ;;  %2529 = vmatpush3.bf16.msra.mxu0 %v2782_v18  ;;  %2509 = vmatpush3.bf16.msra.mxu1 %v2784_v21 }
 0x2aa   :  { %v576_v61 = vcombine.low %v3163_v55, %v3165_v56  ;;  %2530 = vmatprep.subr.bf16.mxu0 %v2785_v20  ;;  %2510 = vmatprep.subr.bf16.mxu1 %v2787_v22 }
 0x2ac   :  { %601 = vrot.lane.b32.xlu0 %v574_v60, %s2923_s26  ;;  %v590_v1 = vrot.slane %v576_v61, %v3116_v23  ;;  %v3260_v60 = vsub.s32 %v714_v53, %v3102_v50 }
 0x2ad   :  { %2531 = vmatpush3.bf16.msra.mxu0 %v2786_v24  ;;  %2511 = vmatpush3.bf16.msra.mxu1 %v2788_v28 }
 0x2ae   :  { %v591_v5 = vcombine.low %v583_v0, %v590_v1  ;;  %v592_v13 = vcombine.high %v583_v0, %v590_v1  ;;  %2532 = vmatprep.subr.bf16.mxu0 %v2789_v27  ;;  %2540 = vmatprep.subr.bf16.mxu1 %v2791_v30 }
 0x2b0   :  { %599 = vrot.lane.b32.xlu1 %v591_v5, %s2923_s26 }
 0x2b1   :  { %2533 = vmatpush3.bf16.msra.mxu0 %v2790_v29  ;;  %v2794_v29 = vld [vmem:[%s3623_s3 + $0x1b8] sm:$0xff]  }
 0x2b2   :  { %2562 = vmatprep.subr.bf16.mxu0 %v2793_v31 }
 0x2b4   :  { %603 = vrot.lane.b32.xlu1 %v592_v13, %s2923_s26 }
 0x31a   :  { %v598_v33 = vpop.permute.xlu0 %597 }
 0x31e   :  { %v602_v34 = vpop.permute.xlu0 %601 }
 0x31f   :  { %v608_v35 = vsel %vm607_vm5, %v598_v33, %v602_v34  ;;  %v610_v36 = vsel %vm607_vm5, %v602_v34, %v598_v33  ;;  %v2796_v33 = vld [vmem:[%s3623_s3 + $0x130] sm:$0xff]  }
 0x320   :  { %v616_v37 = vcombine.low %v608_v35, %v610_v36  ;;  %v617_v0 = vcombine.high %v608_v35, %v610_v36  ;;  %v2799_v35 = vld [vmem:[%s3623_s3 + $0x168] sm:$0xff]  }
 0x322   :  { %v624_v38 = vrot.slane %v616_v37, %v3116_v23  ;;  %v600_v39 = vpop.permute.xlu1 %599  ;;  %v2801_v37 = vld [vmem:[%s3623_s3 + $0x1e8] sm:$0xff]  }
 0x324   :  { %v632_v40 = vcombine.high %v624_v38, %v624_v38  ;;  %v660_v48 = vmax.f32 %v3109_v10, %v624_v38 }
 0x326   :  { %v604_v41 = vpop.permute.xlu1 %603  ;;  %v661_v49 = vmax.f32 %v3111_v11, %v632_v40  ;;  %v2803_v40 = vld [vmem:[%s3623_s3 + $0x160] sm:$0xff]  }
 0x327   :  { %v609_v42 = vsel %vm607_vm5, %v600_v39, %v604_v41  ;;  %v611_v43 = vsel %vm607_vm5, %v604_v41, %v600_v39  ;;  %v2800_v39 = vld [vmem:[%s3623_s3 + $0x128] sm:$0xff]  }
 0x328   :  { %v634_v51 = vcombine.low %v609_v42, %v611_v43  ;;  %v676_v54 = vcombine.low %v660_v48, %v661_v49  ;;  %v635_v63 = vcombine.high %v609_v42, %v611_v43  ;;  %v2802_v42 = vld [vmem:[%s3623_s3 + $0x1a8] sm:$0xff]   ;;  %v2805_v43 = vld [vmem:[%s3623_s3 + $0x1e0] sm:$0xff]   ;;  %v2809_v48 = vld [vmem:[%s3623_s3 + $0x1d8] sm:$0xff]  }
 0x32a   :  { %v642_v52 = vrot.slane %v634_v51, %v3116_v23  ;;  %v683_v61 = vrot.slane %v676_v54, %v3116_v23  ;;  %v649_v2 = vrot.slane %v635_v63, %v3116_v23  ;;  %v2806_v51 = vld [vmem:[%s3623_s3 + $0x1a0] sm:$0xff]   ;;  %v2811_v54 = vld [vmem:[%s3623_s3 + $0x150] sm:$0xff]   ;;  %v2817_v63 = vld [vmem:[%s3623_s3 + $0x1c8] sm:$0xff]  }
 0x32c   :  { %v650_v57 = vcombine.high %v642_v52, %v642_v52  ;;  %v664_v58 = vmax.f32 %v3150_v45, %v642_v52  ;;  %v718_v10 = vrot.slane %v683_v61, %v3260_v60  ;;  %v651_v7 = vcombine.high %v649_v2, %v649_v2  ;;  %v2808_v52 = vld [vmem:[%s3623_s3 + $0x118] sm:$0xff]   ;;  %v2815_v61 = vld [vmem:[%s3623_s3 + $0x148] sm:$0xff]  }
 0x32d   :  { %v666_v27 = vmax.f32 %v3163_v55, %v649_v2  ;;  %v2821_v2 = vld [vmem:[%s3623_s3 + $0x1c0] sm:$0xff]  }
 0x32e   :  { %v665_v59 = vmax.f32 %v3152_v46, %v650_v57  ;;  %v631_v46 = vrot.slane %v617_v0, %v3116_v23  ;;  %v667_v17 = vmax.f32 %v3165_v56, %v651_v7  ;;  %v2795_v56 = vld [vmem:[%s3623_s3 + $0x170] sm:$0xff]   ;;  %v2810_v57 = vld [vmem:[%s3623_s3 + $0x198] sm:$0xff]   ;;  %v2822_v7 = vld [vmem:[%s3623_s3 + $0x180] sm:$0xff]  }
 0x330   :  { %v692_v62 = vcombine.low %v664_v58, %v665_v59  ;;  %v633_v13 = vcombine.high %v631_v46, %v631_v46  ;;  %v700_v55 = vcombine.low %v666_v27, %v667_v17  ;;  %v2813_v58 = vld [vmem:[%s3623_s3 + $0x1d0] sm:$0xff]   ;;  %v2832_v27 = vld [vmem:[%s3623_s3 + $0x228] sm:$0xff]  }
 0x331   :  { %v2812_v59 = vld [vmem:[%s3623_s3 + $0x110] sm:$0xff]  }
 0x332   :  { %v699_v11 = vrot.slane %v692_v62, %v3116_v23  ;;  %v663_v24 = vmax.f32 %v3123_v26, %v633_v13  ;;  %v662_v26 = vmax.f32 %v3121_v25, %v631_v46  ;;  %v2798_v25 = vld [vmem:[%s3623_s3 + $0x1b0] sm:$0xff]   ;;  %v707_v38 = vrot.slane %v700_v55, %v3116_v23  ;;  %v2840_v55 = vld [vmem:[%s3623_s3 + $0x218] sm:$0xff]  }
 0x333   :  { %v2814_v62 = vld [vmem:[%s3623_s3 + $0x190] sm:$0xff]  }
 0x334   :  { %v732_v1 = vrot.slane %v699_v11, %v3260_v60  ;;  %v684_v36 = vcombine.low %v662_v26, %v663_v24  ;;  %v3320_v44 = vrot.slane %v707_v38, %v3260_v60  ;;  %v2816_v11 = vld [vmem:[%s3623_s3 + $0x108] sm:$0xff]   ;;  %v2841_v26 = vld [vmem:[%s3623_s3 + $0x2d8] sm:$0xff]  }
 0x335   :  { %v2833_v24 = vld [vmem:[%s3623_s3 + $0x2e8] sm:$0xff]  }
 0x336   :  { %v744_v3 = vcombine.low %v718_v10, %v732_v1  ;;  %v745_v45 = vcombine.high %v718_v10, %v732_v1  ;;  %v691_v41 = vrot.slane %v684_v36, %v3116_v23  ;;  %v2807_v23 = vld [vmem:[%s3623_s3 + $0x158] sm:$0xff]   ;;  %v2819_v10 = vld [vmem:[%s3623_s3 + $0x140] sm:$0xff]   ;;  %v2818_v1 = vld [vmem:[%s3623_s3 + $0x188] sm:$0xff]  }
 0x337   :  { %v2845_v36 = vld [vmem:[%s3623_s3 + $0x2d0] sm:$0xff]   ;;  %v2847_v38 = vld [vmem:[%s3623_s3 + $0x248] sm:$0xff]  }
 0x338   :  { %v752_v50 = vrot.slane %v744_v3, %v3105_v4  ;;  %v3270_v5 = vrot.slane %v745_v45, %v3105_v4  ;;  %v3329_v49 = vrot.slane %v691_v41, %v3260_v60  ;;  %v2820_v45 = vld [vmem:[%s3623_s3 + $0x100] sm:$0xff]   ;;  %v2848_v41 = vld [vmem:[%s3623_s3 + $0x208] sm:$0xff]  }
 0x33a   :  { %v760_v8 = vcombine.high %v752_v50, %v752_v50  ;;  %v768_v9 = vrot.slane %v752_v50, %v3105_v4  ;;  %v761_v12 = vcombine.high %v3270_v5, %v3270_v5  ;;  %v794_v53 = vcombine.low %v3329_v49, %v3320_v44  ;;  %v2823_v50 = vld [vmem:[%s3623_s3 + $0x278] sm:$0xff]  }
 0x33b   :  { %v775_v3 = vrot.slane %v3270_v5, %v3105_v4  ;;  %v2825_v5 = vld [vmem:[%s3623_s3 + $0x2f8] sm:$0xff]  }
 0x33c   :  { %v782_v14 = vrot.slane %v760_v8, %v3105_v4  ;;  %v789_v15 = vrot.slane %v761_v12, %v3105_v4  ;;  %v790_v16 = vcombine.high %v768_v9, %v768_v9  ;;  %v860_v21 = vpack.c.bf16 %v768_v9, %v768_v9  ;;  %v2824_v9 = vld [vmem:[%s3623_s3 + $0x238] sm:$0xff]  }
 0x33d   :  { %v3355_v60 = vrot.slane %v794_v53, %v3105_v4  ;;  %v791_v8 = vcombine.high %v775_v3, %v775_v3  ;;  %v864_v13 = vpack.c.bf16 %v775_v3, %v775_v3  ;;  %v2865_v3 = vld [vmem:[%s3623_s3 + $0x3e8] sm:$0xff]  }
 0x33e   :  { %v861_v18 = vpack.c.bf16 %v782_v14, %v782_v14  ;;  %v792_v20 = vcombine.high %v782_v14, %v782_v14  ;;  %v793_v22 = vcombine.high %v789_v15, %v789_v15  ;;  %v865_v30 = vpack.c.bf16 %v789_v15, %v789_v15  ;;  %v2827_v14 = vld [vmem:[%s3623_s3 + $0x270] sm:$0xff]  }
 0x33f   :  { %v862_v31 = vpack.c.bf16 %v790_v16, %v790_v16  ;;  %v810_v0 = vcombine.high %v3355_v60, %v3355_v60  ;;  %v2826_v16 = vld [vmem:[%s3623_s3 + $0x2b8] sm:$0xff]   ;;  %v866_v17 = vpack.c.bf16 %v791_v8, %v791_v8  ;;  %v2868_v8 = vld [vmem:[%s3623_s3 + $0x320] sm:$0xff]  }
 0x340   :  { %1939 = vmatprep.mubr.bf16.mxu1 %v861_v18  ;;  %v863_v28 = vpack.c.bf16 %v792_v20, %v792_v20  ;;  %v867_v34 = vpack.c.bf16 %v793_v22, %v793_v22  ;;  %v2829_v18 = vld [vmem:[%s3623_s3 + $0x2f0] sm:$0xff]  }
 0x341   :  { %1940 = vmatmul.mubr.bf16.vlgmr.msra.gmra.mxu1 %v860_v21  ;;  %v832_v46 = vrot.slane %v810_v0, %v3105_v4  ;;  %v2828_v20 = vld [vmem:[%s3623_s3 + $0x230] sm:$0xff]   ;;  %v2831_v21 = vld [vmem:[%s3623_s3 + $0x268] sm:$0xff]  }
 0x342   :  { %2541 = vmatpush3.bf16.msra.mxu1 %v2792_v19  ;;  %1979 = vmatprep.mubr.bf16.mxu0 %v863_v28  ;;  %v2830_v22 = vld [vmem:[%s3623_s3 + $0x2b0] sm:$0xff]   ;;  %v2835_v28 = vld [vmem:[%s3623_s3 + $0x260] sm:$0xff]  }
 0x343   :  { %2019 = vmatprep.mubr.bf16.mxu1 %v865_v30  ;;  %1980 = vmatmul.mubr.bf16.vlgmr.msra.gmra.mxu0 %v862_v31  ;;  %v842_v12 = vcombine.high %v832_v46, %v832_v46  ;;  %v869_v15 = vpack.c.bf16 %v832_v46, %v832_v46  ;;  %v2836_v30 = vld [vmem:[%s3623_s3 + $0x220] sm:$0xff]   ;;  %v2839_v31 = vld [vmem:[%s3623_s3 + $0x258] sm:$0xff]  }
 0x344   :  { %2563 = vmatpush3.bf16.msra.mxu0 %v2794_v29  ;;  %2542 = vmatprep.subr.bf16.mxu1 %v2795_v56  ;;  %v2834_v29 = vld [vmem:[%s3623_s3 + $0x2a8] sm:$0xff]   ;;  %v2837_v56 = vld [vmem:[%s3623_s3 + $0x2e0] sm:$0xff]  }
 0x345   :  { %2059 = vmatprep.mubr.bf16.mxu0 %v867_v34  ;;  %2564 = vmatprep.subr.bf16.mxu0 %v2797_v32  ;;  %v871_v19 = vpack.c.bf16 %v842_v12, %v842_v12  ;;  %v2838_v32 = vld [vmem:[%s3623_s3 + $0x2a0] sm:$0xff]   ;;  %v2843_v34 = vld [vmem:[%s3623_s3 + $0x250] sm:$0xff]   ;;  %v2873_v12 = vld [vmem:[%s3623_s3 + $0x3d8] sm:$0xff]  }
 0x346   :  { %2543 = vmatpush3.bf16.msra.mxu1 %v2796_v33  ;;  %v795_v33 = vcombine.high %v3329_v49, %v3320_v44  ;;  %v2850_v44 = vld [vmem:[%s3623_s3 + $0x288] sm:$0xff]   ;;  %v2852_v49 = vld [vmem:[%s3623_s3 + $0x200] sm:$0xff]  }
 0x347   :  { %2544 = vmatprep.subr.bf16.mxu1 %v2799_v35  ;;  %v2842_v35 = vld [vmem:[%s3623_s3 + $0x298] sm:$0xff]   ;;  %v2867_v46 = vld [vmem:[%s3623_s3 + $0x360] sm:$0xff]  }
 0x348   :  { %2565 = vmatpush3.bf16.msra.mxu0 %v2798_v25  ;;  %v2844_v25 = vld [vmem:[%s3623_s3 + $0x210] sm:$0xff]  }
 0x349   :  { %2566 = vmatprep.subr.bf16.mxu0 %v2801_v37  ;;  %v3461_v37 = vrot.slane %v795_v33, %v3105_v4  ;;  %v2890_v33 = vld [vmem:[%s3625_s5] sm:$0xff]  }
 0x34a   :  { %2545 = vmatpush3.bf16.msra.mxu1 %v2800_v39  ;;  %v2846_v39 = vld [vmem:[%s3623_s3 + $0x290] sm:$0xff]  }
 0x34b   :  { %2546 = vmatprep.subr.bf16.mxu1 %v2803_v40  ;;  %v2849_v40 = vld [vmem:[%s3623_s3 + $0x2c8] sm:$0xff]  }
 0x34c   :  { %2567 = vmatpush3.bf16.msra.mxu0 %v2802_v42  ;;  %v811_v42 = vcombine.high %v3461_v37, %v3461_v37 }
 0x34d   :  { %2568 = vmatprep.subr.bf16.mxu0 %v2805_v43  ;;  %v2851_v43 = vld [vmem:[%s3623_s3 + $0x240] sm:$0xff]  }
 0x34e   :  { %2547 = vmatpush3.bf16.msra.mxu1 %v2804_v47  ;;  %v2853_v47 = vld [vmem:[%s3623_s3 + $0x2c0] sm:$0xff]  }
 0x34f   :  { %2548 = vmatprep.subr.bf16.mxu1 %v2807_v23  ;;  %v818_v23 = vrot.slane %v3355_v60, %v3105_v4  ;;  %v2859_v60 = vld [vmem:[%s3623_s3 + $0x370] sm:$0xff]  }
 0x350   :  { %2569 = vmatpush3.bf16.msra.mxu0 %v2806_v51  ;;  %v839_v51 = vrot.slane %v811_v42, %v3105_v4 }
 0x351   :  { %2570 = vmatprep.subr.bf16.mxu0 %v2809_v48  ;;  %v2855_v48 = vld [vmem:[%s3623_s3 + $0x378] sm:$0xff]   ;;  %v840_v53 = vcombine.high %v818_v23, %v818_v23 }
 0x352   :  { %2549 = vmatpush3.bf16.msra.mxu1 %v2808_v52  ;;  %v2854_v52 = vld [vmem:[%s3623_s3 + $0x280] sm:$0xff]  }
 0x353   :  { %2550 = vmatprep.subr.bf16.mxu1 %v2811_v54  ;;  %v2857_v54 = vld [vmem:[%s3623_s3 + $0x3f8] sm:$0xff]  }
 0x354   :  { %2571 = vmatpush3.bf16.msra.mxu0 %v2810_v57  ;;  %v2856_v57 = vld [vmem:[%s3623_s3 + $0x338] sm:$0xff]  }
 0x355   :  { %2572 = vmatprep.subr.bf16.mxu0 %v2813_v58  ;;  %v843_v58 = vcombine.high %v839_v51, %v839_v51 }
 0x356   :  { %2551 = vmatpush3.bf16.msra.mxu1 %v2812_v59  ;;  %v868_v59 = vpack.c.bf16 %v818_v23, %v818_v23 }
 0x357   :  { %2552 = vmatprep.subr.bf16.mxu1 %v2815_v61  ;;  %v873_v61 = vpack.c.bf16 %v839_v51, %v839_v51  ;;  %v875_v0 = vpack.c.bf16 %v843_v58, %v843_v58 }
 0x358   :  { %2573 = vmatpush3.bf16.msra.mxu0 %v2814_v62  ;;  %v2858_v62 = vld [vmem:[%s3623_s3 + $0x3b8] sm:$0xff]  }
 0x359   :  { %2574 = vmatprep.subr.bf16.mxu0 %v2817_v63  ;;  %v870_v63 = vpack.c.bf16 %v840_v53, %v840_v53 }
 0x35a   :  { %2553 = vmatpush3.bf16.msra.mxu1 %v2816_v11  ;;  %v2861_v11 = vld [vmem:[%s3623_s3 + $0x3f0] sm:$0xff]  }
 0x35b   :  { %2554 = vmatprep.subr.bf16.mxu1 %v2819_v10  ;;  %v2860_v10 = vld [vmem:[%s3623_s3 + $0x330] sm:$0xff]  }
 0x35c   :  { %2575 = vmatpush3.bf16.msra.mxu0 %v2818_v1  ;;  %v2863_v1 = vld [vmem:[%s3623_s3 + $0x368] sm:$0xff]  }
 0x35d   :  { %2576 = vmatprep.subr.bf16.mxu0 %v2821_v2  ;;  %v2862_v2 = vld [vmem:[%s3623_s3 + $0x3b0] sm:$0xff]  }
 0x35e   :  { %2555 = vmatpush3.bf16.msra.mxu1 %v2820_v45  ;;  %v2864_v45 = vld [vmem:[%s3623_s3 + $0x328] sm:$0xff]  }
 0x35f   :  { %2584 = vmatprep.subr.bf16.mxu1 %v2823_v50  ;;  %v2866_v50 = vld [vmem:[%s3623_s3 + $0x3a8] sm:$0xff]  }
 0x360   :  { %2577 = vmatpush3.bf16.msra.mxu0 %v2822_v7  ;;  %v2869_v7 = vld [vmem:[%s3623_s3 + $0x3e0] sm:$0xff]  }
 0x361   :  { %2020 = vmatmul.mubr.bf16.vlgmr.msra.gmra.mxu1 %v864_v13  ;;  %2606 = vmatprep.subr.bf16.mxu0 %v2825_v5  ;;  %v2871_v5 = vld [vmem:[%s3623_s3 + $0x358] sm:$0xff]  }
 0x362   :  { %2585 = vmatpush3.bf16.msra.mxu1 %v2824_v9  ;;  %2099 = vmatprep.mubr.bf16.mxu1 %v869_v15  ;;  %v2870_v9 = vld [vmem:[%s3623_s3 + $0x3a0] sm:$0xff]   ;;  %v2872_v13 = vld [vmem:[%s3623_s3 + $0x318] sm:$0xff]  }
 0x363   :  { %2060 = vmatmul.mubr.bf16.vlgmr.msra.gmra.mxu0 %v866_v17  ;;  %2586 = vmatprep.subr.bf16.mxu1 %v2827_v14  ;;  %v2875_v14 = vld [vmem:[%s3623_s3 + $0x350] sm:$0xff]   ;;  %v2874_v15 = vld [vmem:[%s3623_s3 + $0x398] sm:$0xff]  }
 0x364   :  { %2607 = vmatpush3.bf16.msra.mxu0 %v2826_v16  ;;  %2139 = vmatprep.mubr.bf16.mxu0 %v871_v19  ;;  %v2877_v16 = vld [vmem:[%s3623_s3 + $0x3d0] sm:$0xff]  }
 0x365   :  { %2608 = vmatprep.subr.bf16.mxu0 %v2829_v18  ;;  %v2876_v17 = vld [vmem:[%s3623_s3 + $0x310] sm:$0xff]   ;;  %v2879_v18 = vld [vmem:[%s3623_s3 + $0x348] sm:$0xff]  }
 0x366   :  { %2587 = vmatpush3.bf16.msra.mxu1 %v2828_v20  ;;  %v2878_v19 = vld [vmem:[%s3623_s3 + $0x390] sm:$0xff]   ;;  %v2881_v20 = vld [vmem:[%s3623_s3 + $0x3c8] sm:$0xff]  }
 0x367   :  { %2588 = vmatprep.subr.bf16.mxu1 %v2831_v21  ;;  %v2880_v21 = vld [vmem:[%s3623_s3 + $0x308] sm:$0xff]  }
 0x368   :  { %2609 = vmatpush3.bf16.msra.mxu0 %v2830_v22  ;;  %v2883_v22 = vld [vmem:[%s3623_s3 + $0x340] sm:$0xff]  }
 0x369   :  { %2610 = vmatprep.subr.bf16.mxu0 %v2833_v24  ;;  %v2882_v24 = vld [vmem:[%s3623_s3 + $0x388] sm:$0xff]  }
 0x36a   :  { %2589 = vmatpush3.bf16.msra.mxu1 %v2832_v27  ;;  %v2885_v27 = vld [vmem:[%s3623_s3 + $0x3c0] sm:$0xff]  }
 0x36b   :  { %2590 = vmatprep.subr.bf16.mxu1 %v2835_v28  ;;  %v825_v28 = vrot.slane %v3461_v37, %v3105_v4 }
 0x36c   :  { %2611 = vmatpush3.bf16.msra.mxu0 %v2834_v29  ;;  %v2884_v29 = vld [vmem:[%s3623_s3 + $0x300] sm:$0xff]  }
 0x36d   :  { %2612 = vmatprep.subr.bf16.mxu0 %v2837_v56  ;;  %v2886_v56 = vld [vmem:[%s3623_s3 + $0x380] sm:$0xff]  }
 0x36e   :  { %2591 = vmatpush3.bf16.msra.mxu1 %v2836_v30  ;;  %v841_v30 = vcombine.high %v825_v28, %v825_v28 }
 0x36f   :  { %2592 = vmatprep.subr.bf16.mxu1 %v2839_v31  ;;  %v872_v31 = vpack.c.bf16 %v825_v28, %v825_v28 }
 0x370   :  { %2613 = vmatpush3.bf16.msra.mxu0 %v2838_v32  ;;  %v874_v4 = vpack.c.bf16 %v841_v30, %v841_v30  ;;  %v2887_v32 = vld [vmem:[%s3625_s5 + $0x18] sm:$0xff]  }
 0x371   :  { %2614 = vmatprep.subr.bf16.mxu0 %v2841_v26  ;;  %v2888_v26 = vld [vmem:[%s3625_s5 + $0x10] sm:$0xff]  }
 0x372   :  { %2593 = vmatpush3.bf16.msra.mxu1 %v2840_v55  ;;  %v2889_v55 = vld [vmem:[%s3625_s5 + $0x8] sm:$0xff]  }
 0x373   :  { %2594 = vmatprep.subr.bf16.mxu1 %v2843_v34 }
 0x374   :  { %2615 = vmatpush3.bf16.msra.mxu0 %v2842_v35  ;;  %v2361_v35 = vld [vmem:[%s3624_s4] ss:$0 sm:$0xff] }
 0x375   :  { %2616 = vmatprep.subr.bf16.mxu0 %v2845_v36 }
 0x376   :  { %2595 = vmatpush3.bf16.msra.mxu1 %v2844_v25 }
 0x377   :  { %2596 = vmatprep.subr.bf16.mxu1 %v2847_v38 }
 0x378   :  { %2617 = vmatpush3.bf16.msra.mxu0 %v2846_v39 }
 0x379   :  { %2618 = vmatprep.subr.bf16.mxu0 %v2849_v40 }
 0x37a   :  { %2597 = vmatpush3.bf16.msra.mxu1 %v2848_v41 }
 0x37b   :  { %2598 = vmatprep.subr.bf16.mxu1 %v2851_v43 }
 0x37c   :  { %2619 = vmatpush3.bf16.msra.mxu0 %v2850_v44 }
 0x37d   :  { %2620 = vmatprep.subr.bf16.mxu0 %v2853_v47 }
 0x37e   :  { %2599 = vmatpush3.bf16.msra.mxu1 %v2852_v49 }
 0x37f   :  { %2628 = vmatprep.subr.bf16.mxu1 %v2855_v48 }
 0x380   :  { %2621 = vmatpush3.bf16.msra.mxu0 %v2854_v52 }
 0x381   :  { %2100 = vmatmul.mubr.bf16.vlgmr.msra.gmra.mxu1 %v868_v59  ;;  %2650 = vmatprep.subr.bf16.mxu0 %v2857_v54 }
 0x382   :  { %2629 = vmatpush3.bf16.msra.mxu1 %v2856_v57  ;;  %2179 = vmatprep.mubr.bf16.mxu1 %v873_v61 }
 0x383   :  { %2140 = vmatmul.mubr.bf16.vlgmr.msra.gmra.mxu0 %v870_v63  ;;  %2630 = vmatprep.subr.bf16.mxu1 %v2859_v60 }
 0x384   :  { %2651 = vmatpush3.bf16.msra.mxu0 %v2858_v62  ;;  %2219 = vmatprep.mubr.bf16.mxu0 %v875_v0 }
 0x385   :  { %2652 = vmatprep.subr.bf16.mxu0 %v2861_v11 }
 0x386   :  { %2631 = vmatpush3.bf16.msra.mxu1 %v2860_v10 }
 0x387   :  { %2632 = vmatprep.subr.bf16.mxu1 %v2863_v1 }
 0x388   :  { %2653 = vmatpush3.bf16.msra.mxu0 %v2862_v2 }
 0x389   :  { %2654 = vmatprep.subr.bf16.mxu0 %v2865_v3 }
 0x38a   :  { %2633 = vmatpush3.bf16.msra.mxu1 %v2864_v45 }
 0x38b   :  { %2634 = vmatprep.subr.bf16.mxu1 %v2867_v46 }
 0x38c   :  { %2655 = vmatpush3.bf16.msra.mxu0 %v2866_v50 }
 0x38d   :  { %2656 = vmatprep.subr.bf16.mxu0 %v2869_v7 }
 0x38e   :  { %2635 = vmatpush3.bf16.msra.mxu1 %v2868_v8 }
 0x38f   :  { %2636 = vmatprep.subr.bf16.mxu1 %v2871_v5 }
 0x390   :  { %2657 = vmatpush3.bf16.msra.mxu0 %v2870_v9 }
 0x391   :  { %2658 = vmatprep.subr.bf16.mxu0 %v2873_v12 }
 0x392   :  { %2637 = vmatpush3.bf16.msra.mxu1 %v2872_v13 }
 0x393   :  { %2638 = vmatprep.subr.bf16.mxu1 %v2875_v14 }
 0x394   :  { %2659 = vmatpush3.bf16.msra.mxu0 %v2874_v15 }
 0x395   :  { %2660 = vmatprep.subr.bf16.mxu0 %v2877_v16 }
 0x396   :  { %2639 = vmatpush3.bf16.msra.mxu1 %v2876_v17 }
 0x397   :  { %2640 = vmatprep.subr.bf16.mxu1 %v2879_v18 }
 0x398   :  { %2661 = vmatpush3.bf16.msra.mxu0 %v2878_v19 }
 0x399   :  { %2662 = vmatprep.subr.bf16.mxu0 %v2881_v20 }
 0x39a   :  { %2641 = vmatpush3.bf16.msra.mxu1 %v2880_v21 }
 0x39b   :  { %2642 = vmatprep.subr.bf16.mxu1 %v2883_v22  ;;  %v2490_v22 = vld [vmem:[%s3626_s6] ss:$0 sm:$0xff] }
 0x39c   :  { %2663 = vmatpush3.bf16.msra.mxu0 %v2882_v24 }
 0x39d   :  { %2664 = vmatprep.subr.bf16.mxu0 %v2885_v27 }
 0x39e   :  { %2643 = vmatpush3.bf16.msra.mxu1 %v2884_v29 }
 0x39f   :  { %2677 = vmatprep.subr.bf16.mxu1 %v2918_v6 }
 0x3a0   :  { %2665 = vmatpush3.bf16.msra.mxu0 %v2886_v56 }
 0x3a1   :  { %2180 = vmatmul.mubr.bf16.vlgmr.msra.gmra.mxu1 %v872_v31 }
 0x3a2   :  { %2678 = vmatpush3.bf16.msra.mxu1 %v2887_v32  ;;  %2685 = vmatprep.mubr.msk.bf16.mxu1 %vm2925_vm6, %v2918_v6 }
 0x3a3   :  { %2220 = vmatmul.mubr.bf16.vlgmr.msra.gmra.mxu0 %v874_v4  ;;  %2679 = vmatprep.subr.bf16.mxu1 %v2918_v6 }
 0x3a6   :  { %2680 = vmatpush3.bf16.msra.mxu1 %v2888_v26 }
 0x3a7   :  { %2681 = vmatprep.subr.bf16.mxu1 %v2918_v6 }
 0x3aa   :  { %2682 = vmatpush3.bf16.msra.mxu1 %v2889_v55 }
 0x3ab   :  { %2683 = vmatprep.subr.bf16.mxu1 %v2918_v6 }
 0x3ae   :  { %2684 = vmatpush3.bf16.msra.mxu1 %v2890_v33 }
 0x401   :  { %v2512_v34 = vpop.f32.mrf.mxu1 }
 0x403   :  { %v2513_v36 = vpop.f32.mrf.mxu1  ;;  %v2534_v25 = vpop.f32.mrf.mxu0 }
 0x404   :  { %v2514_v37 = vadd.f32 %v2513_v36, %v2512_v34 }
 0x405   :  { %v2515_v38 = vpop.f32.mrf.mxu1  ;;  %v2535_v39 = vpop.f32.mrf.mxu0 }
 0x406   :  { %v1942_v40 = vadd.f32 %v2514_v37, %v2361_v35  ;;  %v2536_v41 = vadd.f32 %v2535_v39, %v2534_v25 }
 0x407   :  { %v2516_v42 = vpop.f32.mrf.mxu1  ;;  %v2537_v43 = vpop.f32.mrf.mxu0 }
 0x408   :  { %v1982_v44 = vadd.f32 %v2536_v41, %v1942_v40 }
 0x409   :  { %v2538_v47 = vpop.f32.mrf.mxu0 }
 0x421   :  { %v2556_v23 = vpop.f32.mrf.mxu1 }
 0x423   :  { %v2557_v49 = vpop.f32.mrf.mxu1  ;;  %v2578_v6 = vpop.f32.mrf.mxu0 }
 0x424   :  { %v2558_v0 = vadd.f32 %v2557_v49, %v2556_v23 }
 0x425   :  { %v2559_v51 = vpop.f32.mrf.mxu1  ;;  %v2579_v48 = vpop.f32.mrf.mxu0 }
 0x426   :  { %v2022_v10 = vadd.f32 %v2558_v0, %v1982_v44  ;;  %v2580_v1 = vadd.f32 %v2579_v48, %v2578_v6 }
 0x427   :  { %v2560_v52 = vpop.f32.mrf.mxu1  ;;  %v2581_v53 = vpop.f32.mrf.mxu0 }
 0x428   :  { %v2062_v3 = vadd.f32 %v2580_v1, %v2022_v10 }
 0x429   :  { %v2582_v54 = vpop.f32.mrf.mxu0 }
 0x441   :  { %v2600_v57 = vpop.f32.mrf.mxu1 }
 0x443   :  { %v2601_v58 = vpop.f32.mrf.mxu1  ;;  %v2622_v59 = vpop.f32.mrf.mxu0 }
 0x444   :  { %v2602_v2 = vadd.f32 %v2601_v58, %v2600_v57 }
 0x445   :  { %v2603_v60 = vpop.f32.mrf.mxu1  ;;  %v2623_v61 = vpop.f32.mrf.mxu0 }
 0x446   :  { %v2102_v45 = vadd.f32 %v2602_v2, %v2062_v3  ;;  %v2624_v46 = vadd.f32 %v2623_v61, %v2622_v59 }
 0x447   :  { %v2604_v62 = vpop.f32.mrf.mxu1  ;;  %v2625_v63 = vpop.f32.mrf.mxu0 }
 0x448   :  { %v2142_v5 = vadd.f32 %v2624_v46, %v2102_v45 }
 0x449   :  { %v2626_v11 = vpop.f32.mrf.mxu0 }
 0x461   :  { %v2644_v50 = vpop.f32.mrf.mxu1 }
 0x463   :  { %v2645_v7 = vpop.f32.mrf.mxu1  ;;  %v2666_v8 = vpop.f32.mrf.mxu0 }
 0x464   :  { %v2646_v9 = vadd.f32 %v2645_v7, %v2644_v50 }
 0x465   :  { %v2647_v12 = vpop.f32.mrf.mxu1  ;;  %v2667_v13 = vpop.f32.mrf.mxu0 }
 0x466   :  { %v2182_v14 = vadd.f32 %v2646_v9, %v2142_v5  ;;  %v2668_v15 = vadd.f32 %v2667_v13, %v2666_v8 }
 0x467   :  { %v2648_v16 = vpop.f32.mrf.mxu1  ;;  %v2669_v17 = vpop.f32.mrf.mxu0 }
 0x468   :  { %v2222_v18 = vadd.f32 %v2668_v15, %v2182_v14 }
 0x469   :  { %v2670_v19 = vpop.f32.mrf.mxu0 }
 0x46a   :  { %v2227_v20 = vmax.f32 %v2222_v18, 0.0 }
 0x46c   :  { %v2228_v21 = vpack.c.bf16 %v2227_v20, %v2227_v20 }
 0x46e   :  { %2686 = vmatmul.mubr.msk.bf16.vlgmr.msra.gmra.mxu1 %vm37_vm0, %v2228_v21 }
 0x52e   :  { %v2305_v24 = vpop.f32.mrf.mxu1 }
 0x52f   :  { %v2306_v27 = vadd.f32 %v2490_v22, %v2305_v24 }
 0x530   :  { %v2687_v28 = vpop.f32.mrf.mxu1 }
 0x531   :  { %v2311_v29 = vsub.f32 0.0, %v2306_v27 }
 0x532   :  { %v2308_v56 = vpop.f32.mrf.mxu1 }
 0x533   :  { %v2312_v30 = vmul.f32 1.442695, %v2311_v29 }
 0x534   :  { %v2688_v31 = vpop.f32.mrf.mxu1 }
 0x535   :  { %2891 = vpow2.f32 %v2312_v30 }
 0x542   :  { %v2892_v4 = vpop.eup %2891 }
 0x543   :  { %v2314_v32 = vadd.f32 1.0, %v2892_v4 }
 0x545   :  { %2893 = vrcp.f32 %v2314_v32 }
 0x552   :  { %v2894_v26 = vpop.eup %2893 }
 0x553   :  { %2318 = vst.msk [vmem:[#allocation4] sm:$0x3] %vm2317_vm7, %v2894_v26 }
 0x554   :  { %2906 = shalt.err (!%p2903_p4)
}
 0x555   :  { %2328 = dma.vmem_to_hbm [thread:$0]  %s2326_s15, 32, %s3627_s7, [#allocation5]  }
 0x556   :  { %2915 = dma.done.wait [#allocation5], 32  }
 0x557   :  { %2916 = vsyncadd [#allocation5], 4294967264 }
 0x558   :  { %2332 = vsyncpa [#allocation5], 1 }

</bundles_post_ra>
